<compile_context>
chip_gen: v5e
topology: v5e:2x2
jax: 0.10.0
libtpu: 0.0.40
codegen_flags: <defaults>
</compile_context>

<pallas_src>
import math

import jax
import jax.numpy as jnp
from jax.experimental import pallas as pl
from jax.experimental.pallas import tpu as pltpu


_LANES = 128                      # TPU vreg lane width
_SUBLANES = 8                     # f32 sublane count (tile rows are multiples of this)
_TILE_BYTES = 2 * 1024 * 1024     # per-block VMEM budget; x/out/pe double-buffered ~= 12 MiB
_VMEM_LIMIT_BYTES = 32 * 1024 * 1024


def make_positional_encoding(d_model: int, max_len: int = 5000,
                             dtype=jnp.float32) -> jnp.ndarray:
    """Deterministic buffer identical to the PyTorch register_buffer 'pe'.

    Returns shape [max_len, d_model] (the PyTorch buffer is [1, max_len, d_model];
    the leading broadcast dim is handled by the kernel's BlockSpec).
    """
    if d_model % 2 != 0:
        raise ValueError(
            f"d_model must be even (got {d_model}); the sin/cos interleave "
            "requires an even feature dimension (same constraint as the "
            "original PyTorch module).")
    position = jnp.arange(0, max_len, dtype=jnp.float32)[:, None]           # [L, 1]
    div_term = jnp.exp(
        jnp.arange(0, d_model, 2, dtype=jnp.float32)
        * (-math.log(10000.0) / d_model))                                   # [D/2]
    pe = jnp.zeros((max_len, d_model), dtype=jnp.float32)
    pe = pe.at[:, 0::2].set(jnp.sin(position * div_term))
    pe = pe.at[:, 1::2].set(jnp.cos(position * div_term))
    return pe.astype(dtype)


def _pos_enc_kernel(x_ref, pe_ref, o_ref):
    # x_ref / o_ref / pe_ref: (TR, C) tiles (batch dim squeezed out by BlockSpec).
    # Pure VPU elementwise add -> the workload is HBM-bandwidth bound; all the
    # tuning lives in the BlockSpec/tiling, not here.
    o_ref[...] = x_ref[...] + pe_ref[...]


def _round_down_multiple(x: int, m: int) -> int:
    return (x // m) * m


def positional_encoding_forward(x: jnp.ndarray, pe: jnp.ndarray) -> jnp.ndarray:
    """x: [B, S, D], pe: [max_len, D]  ->  [B, S, D]  (x + pe[:S])."""
    B, S, D = x.shape
    max_len, d_model = pe.shape
    if D != d_model:
        raise ValueError(f"x feature dim {D} != pe d_model {d_model}")
    if S > max_len:
        raise ValueError(f"sequence length {S} exceeds max_len {max_len}")

    # Mirrors self.pe[:, :x.size(1)]; cast once so the in-kernel add stays in
    # x.dtype (halves pe traffic / avoids implicit up-cast for bf16 activations).
    pe_slice = pe[:S, :].astype(x.dtype)

    # Pick a lane-dense 2D "plane" view (R, C) of each batch's (S, D) slab.
    if D % _LANES == 0:
        R, C = S, D                          # already lane-dense
    elif (S * D) % _LANES == 0:
        R, C = (S * D) // _LANES, _LANES     # free contiguous reshape -> 128 lanes
    else:
        R, C = S, D                          # fallback: masked lane stores (still correct)

    x_view = x.reshape(B, R, C)
    pe_view = pe_slice.reshape(R, C)

    # Row-tile size: multiple of 8 sublanes, capped by a per-block VMEM budget
    # so double-buffered x-in / out / pe fit comfortably on every generation.
    itemsize = jnp.dtype(x.dtype).itemsize
    rows_cap = max(_SUBLANES,
                   _round_down_multiple(_TILE_BYTES // (C * itemsize), _SUBLANES))
    tr = R if R <= rows_cap else rows_cap
    grid = (B, pl.cdiv(R, tr))

    out = pl.pallas_call(
        _pos_enc_kernel,
        out_shape=jax.ShapeDtypeStruct((B, R, C), x.dtype),
        grid=grid,
        in_specs=[
            # x: one (TR, C) tile of one batch row; batch dim squeezed (None).
            pl.BlockSpec((None, tr, C), lambda b, r: (b, r, 0)),
            # pe: same tile for every batch index -> stays resident across b.
            pl.BlockSpec((tr, C), lambda b, r: (r, 0)),
        ],
        out_specs=pl.BlockSpec((None, tr, C), lambda b, r: (b, r, 0)),
        # Output may reuse x's buffer when the caller donates it (in-place add).
        input_output_aliases={0: 0},
        compiler_params=pltpu.CompilerParams(
            dimension_semantics=("parallel", "parallel"),
            vmem_limit_bytes=_VMEM_LIMIT_BYTES,
        ),
    )(x_view, pe_view)

    return out.reshape(B, S, D)


if __name__ == "__main__":
    d_model = 48
    max_len = 96
    batch = 2
    seq = 8

    pe = make_positional_encoding(d_model, max_len)

    key = jax.random.PRNGKey(0)
    x = jax.random.normal(key, (batch, seq, d_model), dtype=jnp.float32)

    # Pure-JAX reference, computed BEFORE the kernel call (the kernel may alias
    # x's buffer via input_output_aliases when the input is donatable).
    ref = x + pe[None, :seq, :]

    out = positional_encoding_forward(x, pe)
    out = jax.block_until_ready(out)

    assert out.shape == (batch, seq, d_model)
    assert jnp.allclose(out, ref, atol=1e-6, rtol=1e-6)

    print("KERNEL_OK")
</pallas_src>

<mosaic_0001>
module attributes {stable_mosaic.version = 11 : i64} {
  func.func @_pos_enc_kernel(%arg0: i32, %arg1: i32, %arg2: memref<1x3x128xf32, #tpu.memory_space<vmem>>, %arg3: memref<3x128xf32, #tpu.memory_space<vmem>>, %arg4: memref<1x3x128xf32, #tpu.memory_space<vmem>>) attributes {dimension_semantics = [#tpu.dimension_semantics<parallel>, #tpu.dimension_semantics<parallel>], iteration_bounds = array<i64: 2, 1>, scalar_prefetch = 0 : i64, scratch_operands = 0 : i64, tpu.core_type = #tpu.core_type<tc>, window_params = [{transform_indices = @transform_0, window_bounds = array<i64: 1, 3, 128>}, {transform_indices = @transform_1, window_bounds = array<i64: 3, 128>}, {transform_indices = @transform_2, window_bounds = array<i64: 1, 3, 128>}]} {
    %c0 = arith.constant 0 : index
    %c0_0 = arith.constant 0 : index
    %c0_1 = arith.constant 0 : index
    %0 = vector.load %arg2[%c0, %c0_0, %c0_1] : memref<1x3x128xf32, #tpu.memory_space<vmem>>, vector<1x3x128xf32>
    %1 = vector.shape_cast %0 : vector<1x3x128xf32> to vector<3x128xf32>
    %c0_2 = arith.constant 0 : index
    %c0_3 = arith.constant 0 : index
    %2 = vector.load %arg3[%c0_2, %c0_3] : memref<3x128xf32, #tpu.memory_space<vmem>>, vector<3x128xf32>
    %3 = arith.addf %1, %2 : vector<3x128xf32>
    %c0_4 = arith.constant 0 : index
    %c0_5 = arith.constant 0 : index
    %c0_6 = arith.constant 0 : index
    %4 = vector.load %arg4[%c0_4, %c0_5, %c0_6] : memref<1x3x128xf32, #tpu.memory_space<vmem>>, vector<1x3x128xf32>
    %5 = vector.shape_cast %4 : vector<1x3x128xf32> to vector<3x128xf32>
    %6 = vector.shape_cast %3 : vector<3x128xf32> to vector<1x3x128xf32>
    tpu.vector_store %arg4[%c0_4, %c0_5, %c0_6], %6 {strides = array<i32>} : memref<1x3x128xf32, #tpu.memory_space<vmem>>, vector<1x3x128xf32>,
    return
  }
  func.func @transform_0(%arg0: i32, %arg1: i32) -> (i32, i32, i32) {
    %c0_i32 = arith.constant 0 : i32
    %c0_i32_0 = arith.constant 0 : i32
    return %arg0, %arg1, %c0_i32 : i32, i32, i32
  }
  func.func @transform_1(%arg0: i32, %arg1: i32) -> (i32, i32) {
    %c0_i32 = arith.constant 0 : i32
    %c0_i32_0 = arith.constant 0 : i32
    return %arg1, %c0_i32 : i32, i32
  }
  func.func @transform_2(%arg0: i32, %arg1: i32) -> (i32, i32, i32) {
    %c0_i32 = arith.constant 0 : i32
    %c0_i32_0 = arith.constant 0 : i32
    return %arg0, %arg1, %c0_i32 : i32, i32, i32
  }
}

</mosaic_0001>

<bundles_post_ra>
// kernel: tpu_custom_call.1
= control target key start
LH: loop header
LB: loop body
LE: loop exit
PB: predicated region body
PF: predicated region fallthrough
CT: control target
= control target key end

     0   :  { %s354_s9 = smov 0   ;;  %s331_s10 = smov 0   ;;  %s368_s0 = inlined_call_operand.vmem [shape: f32[2,3,128], index: 0, kind: input, shape index: {}, may-alias: {0,2}]   ;;  %s369_s1 = inlined_call_operand.vmem [shape: f32[3,128], index: 1, kind: input, shape index: {}]   ;;  %s370_s2 = inlined_call_operand.vmem [shape: f32[2,3,128], index: 2, kind: output, shape index: {}, may-alias: {0,2}]  }
   0x1   :  { %s335_s11 = smov 0  }
   0x2 LB: > { %s24_s12 = sadd.s32 1, %s333_s10  ;;  %p286_p0 = scmp.ge.s32.totalorder %s337_s11, 1  ;;  %s337_s11 = sphi %s335_s11, %s12_s11   ;;  %s333_s10 = sphi %s331_s10, %s332_s10   ;;  %s329_s9 = sphi %s354_s9, %s371_s9  }
   0x3   : > { %p26_p1 = scmp.ge.s32.totalorder %s24_s12, 2  ;;  %p139_p2 = scmp.lt.s32.totalorder %s337_s11, 3 }
   0x5   : > { %s373_s12 = smov (%p26_p1, %s24_s12), 0  ;;  %p140_p3 = pnand %p286_p0, %p139_p2 }
   0x6   : > { %p169_p4 = scmp.lt.s32.totalorder (!%p140_p3), %s329_s9, 1 }
   0x7   : > { %143 = sbr.rel (%p140_p3) target bundleno = 19 (0x13), region = 28 }
   0xc   : > { %s375_s9 = smov (!%p169_p4, %s329_s9), 1  ;;  %v188_v0 = vld [vmem:[%s369_s1] sm:$0x7] }
   0xd   : > { %s287_s13 = sshll.u32 %s375_s9, 2 }
   0xe   : > { %s175_s18 = scalar_lea.vmem %s368_s0, %s287_s13  ;;  %s186_s21 = scalar_lea.vmem %s370_s2, %s287_s13 }
   0xf   : > { %v187_v1 = vld [vmem:[%s175_s18] sm:$0x7] }
  0x10   : > { %v189_v2 = vadd.f32 %v188_v0, %v187_v1 }
  0x12   : > { %190 = vst [vmem:[%s186_s21] sm:$0x7] %v189_v2 }
  0x13 PF: > { %s12_s11 = sadd.s32 1, %s337_s11   ;;  %s371_s9 = smov %s333_s10 }
  0x14   : > { %p9_p5 = scmp.ge.s32.totalorder %s12_s11, 4   ;;  %s332_s10 = smov %s373_s12  }
  0x16   :  { %11 = sbr.rel (!%p9_p5) target bundleno = 2 (0x2), region = 61 }

</bundles_post_ra>
